<compile_context>
chip_gen: v7x
topology: tpu7x:2x2x1
jax: 0.10.0
libtpu: 0.0.40
codegen_flags: <defaults>
</compile_context>

<pallas_src>
import functools

import numpy as np
import jax
import jax.numpy as jnp
from jax.experimental import pallas as pl
from jax.experimental.pallas import tpu as pltpu

LANE = 128


def _round_up(x, m):
    return ((x + m - 1) // m) * m


# ---------------------------------------------------------------------------
# 1) TimeEncode kernel (lane-packed, batch-tiled, MXU-based replication)
# ---------------------------------------------------------------------------
def _time_encode_kernel(ts_ref, rmat_ref, phase_ref, out_ref):
    """ts: [R, pack]; rmat: [pack, pack*D] block-diag freq; phase: [1, pack*D]."""
    # One tiny MXU matmul both replicates each of the `pack` timestamps across
    # its D-lane slice and applies basis_freq:
    #   arg[r, c] = ts[r, c // D] * freq[c % D]
    # This keeps the VPU free for the cos range-reduction/polynomial (the
    # saturating slot) and keeps the ts VMEM block narrow.
    arg = jnp.dot(ts_ref[...], rmat_ref[...], preferred_element_type=jnp.float32)
    out_ref[...] = jnp.cos(arg + phase_ref[...]).astype(out_ref.dtype)


def time_encode(ts, basis_freq, phase, *, tile_rows=4096,
                out_dtype=jnp.float32, t_offset=None):
    """cos(ts[:,None]*freq[None,:] + phase[None,:]) -> [B, D] in out_dtype.

    out_dtype=jnp.bfloat16 halves HBM writeback (this kernel is store-bound on
    v5e/v6e); f32 default keeps parity with the PyTorch module.
    t_offset: subtract before encoding (recommended for epoch-scale timestamps).
    """
    ts = ts.astype(jnp.float32)
    if t_offset is not None:
        ts = ts - jnp.asarray(t_offset, jnp.float32)
    B = ts.shape[0]
    D = basis_freq.shape[0]

    # Pack `pack` consecutive timestamps per 128-lane output row when D < 128
    # so every output store is a full, unmasked vreg row.
    pack = LANE // D if (D < LANE and LANE % D == 0) else 1

    rows = pl.cdiv(B, pack)
    tile_r = min(tile_rows, _round_up(rows, 8))    # keep sublane dim 8-aligned
    grid_rows = pl.cdiv(rows, tile_r)
    rows_padded = grid_rows * tile_r
    b_padded = rows_padded * pack
    if b_padded != B:
        ts = jnp.pad(ts, (0, b_padded - B))
    ts2 = ts.reshape(rows_padded, pack)

    freq32 = basis_freq.astype(jnp.float32)
    # rmat[j, j*D + k] = freq[k], zero elsewhere (block-diagonal replication).
    rmat = jnp.kron(jnp.eye(pack, dtype=jnp.float32), freq32[None, :])
    phase_row = jnp.tile(phase.astype(jnp.float32), pack)[None, :]

    out_bytes = rows_padded * pack * D * jnp.dtype(out_dtype).itemsize
    cost = pl.CostEstimate(
        flops=2 * rows_padded * pack * (pack * D) + 2 * rows_padded * pack * D,
        transcendentals=rows_padded * pack * D,
        bytes_accessed=ts2.size * 4 + out_bytes + 2 * pack * D * 4,
    )

    out_packed = pl.pallas_call(
        _time_encode_kernel,
        out_shape=jax.ShapeDtypeStruct((rows_padded, pack * D), out_dtype),
        grid=(grid_rows,),
        in_specs=[
            # NOTE: this [tile_r, pack] block lane-pads pack->128 in VMEM
            # (~tile_r * 512 B per buffer of mostly padding); budgeted for in
            # the default tile_rows so total stays well under v5e's 16 MiB.
            pl.BlockSpec((tile_r, pack), lambda i: (i, 0)),
            pl.BlockSpec((pack, pack * D), lambda i: (0, 0)),   # VMEM-resident
            pl.BlockSpec((1, pack * D), lambda i: (0, 0)),      # VMEM-resident
        ],
        out_specs=pl.BlockSpec((tile_r, pack * D), lambda i: (i, 0)),
        compiler_params=pltpu.CompilerParams(
            dimension_semantics=("parallel",)),                 # v7x megacore
        cost_estimate=cost,
    )(ts2, rmat, phase_row)

    out = out_packed.reshape(b_padded, D)          # row-major un-pack, free
    if b_padded != B:
        out = out[:B]
    return out


# ---------------------------------------------------------------------------
# 2) Fused per-edge message kernel: mail = [si | sj | cos(t*w + phi) | e]
# ---------------------------------------------------------------------------
def _message_mail_kernel(ts_ref, si_ref, sj_ref, e_ref, freq_ref, phase_ref,
                         out_ref):
    ds = si_ref.shape[1]
    dt = freq_ref.shape[1]
    de = e_ref.shape[1]
    time_emb = jnp.cos(ts_ref[...] * freq_ref[...] + phase_ref[...])  # [T, dt]
    # All segment boundaries are multiples of 128 -> unmasked full-vreg stores.
    out_ref[:, 0:ds] = si_ref[...].astype(out_ref.dtype)
    out_ref[:, ds:2 * ds] = sj_ref[...].astype(out_ref.dtype)
    out_ref[:, 2 * ds:2 * ds + dt] = time_emb.astype(out_ref.dtype)
    out_ref[:, 2 * ds + dt:2 * ds + dt + de] = e_ref[...].astype(out_ref.dtype)


def message_mail(si, sj, t, e, basis_freq, phase, *, tile_edges=1024,
                 out_dtype=jnp.float32):
    """Per-edge mail: concat([si, sj, TimeEncode(t), e], axis=1)."""
    E, d_s = si.shape
    d_e = e.shape[1]
    d_t = basis_freq.shape[0]
    d_out = 2 * d_s + d_t + d_e

    if (d_s % LANE) or (d_t % LANE) or (d_e % LANE):
        # Lane-unaligned segment widths would turn every store into a masked
        # vst.msk with lane shifts (the big streaming-store cliff); keep those
        # configs on XLA rather than silently degrading the Pallas path.
        temb = jnp.cos(t.astype(jnp.float32)[:, None]
                       * basis_freq.astype(jnp.float32)[None, :]
                       + phase.astype(jnp.float32)[None, :])
        return jnp.concatenate(
            [si.astype(jnp.float32), sj.astype(jnp.float32), temb,
             e.astype(jnp.float32)], axis=1).astype(out_dtype)

    tile_e = min(tile_edges, _round_up(E, 8))
    grid_e = pl.cdiv(E, tile_e)
    e_padded = grid_e * tile_e
    if e_padded != E:
        pad = e_padded - E
        si = jnp.pad(si, ((0, pad), (0, 0)))
        sj = jnp.pad(sj, ((0, pad), (0, 0)))
        e = jnp.pad(e, ((0, pad), (0, 0)))
        t = jnp.pad(t, (0, pad))

    ts2 = t.astype(jnp.float32).reshape(e_padded, 1)
    freq_row = basis_freq.astype(jnp.float32).reshape(1, d_t)
    phase_row = phase.astype(jnp.float32).reshape(1, d_t)

    out = pl.pallas_call(
        _message_mail_kernel,
        out_shape=jax.ShapeDtypeStruct((e_padded, d_out), out_dtype),
        grid=(grid_e,),
        in_specs=[
            pl.BlockSpec((tile_e, 1), lambda i: (i, 0)),
            pl.BlockSpec((tile_e, d_s), lambda i: (i, 0)),
            pl.BlockSpec((tile_e, d_s), lambda i: (i, 0)),
            pl.BlockSpec((tile_e, d_e), lambda i: (i, 0)),
            pl.BlockSpec((1, d_t), lambda i: (0, 0)),           # VMEM-resident
            pl.BlockSpec((1, d_t), lambda i: (0, 0)),           # VMEM-resident
        ],
        out_specs=pl.BlockSpec((tile_e, d_out), lambda i: (i, 0)),
        compiler_params=pltpu.CompilerParams(
            dimension_semantics=("parallel",)),
    )(ts2, si, sj, e, freq_row, phase_row)

    if e_padded != E:
        out = out[:E]
    return out


# ---------------------------------------------------------------------------
# 3) Fused mail + consumer projection: out = mail @ W + b, mail never stored
# ---------------------------------------------------------------------------
def _message_project_kernel(ts_ref, si_ref, sj_ref, e_ref, freq_ref, phase_ref,
                            w_ref, b_ref, out_ref, *, d_s, d_t, d_e):
    time_emb = jnp.cos(ts_ref[...] * freq_ref[...] + phase_ref[...])  # [T, d_t]
    # Row-split consumer weight: mail @ W == si@W0 + sj@W1 + temb@W2 + e@W3,
    # so the [T, 2*d_s+d_t+d_e] mail never exists (neither in VMEM nor HBM).
    acc = jnp.dot(si_ref[...], w_ref[0:d_s, :],
                  preferred_element_type=jnp.float32)
    acc += jnp.dot(sj_ref[...], w_ref[d_s:2 * d_s, :],
                   preferred_element_type=jnp.float32)
    acc += jnp.dot(time_emb, w_ref[2 * d_s:2 * d_s + d_t, :],
                   preferred_element_type=jnp.float32)
    acc += jnp.dot(e_ref[...], w_ref[2 * d_s + d_t:2 * d_s + d_t + d_e, :],
                   preferred_element_type=jnp.float32)
    out_ref[...] = (acc + b_ref[...]).astype(out_ref.dtype)


def message_mail_project(si, sj, t, e, basis_freq, phase, w, b, *,
                         tile_edges=1024, out_dtype=jnp.float32):
    """Fused id_msg_func + consumer: concat([si, sj, cos(t*f+p), e]) @ w + b."""
    E, d_s = si.shape
    d_e = e.shape[1]
    d_t = basis_freq.shape[0]
    d_out = 2 * d_s + d_t + d_e
    H = w.shape[1]
    assert w.shape[0] == d_out, "weight rows must match mail width"

    if (d_s % LANE) or (d_t % LANE) or (d_e % LANE):
        # Same 128-lane alignment contract as message_mail; fall back to XLA.
        temb = jnp.cos(t.astype(jnp.float32)[:, None]
                       * basis_freq.astype(jnp.float32)[None, :]
                       + phase.astype(jnp.float32)[None, :])
        mail = jnp.concatenate([si, sj, temb, e], axis=1).astype(jnp.float32)
        return (mail @ w.astype(jnp.float32)
                + b.astype(jnp.float32)).astype(out_dtype)

    tile_e = min(tile_edges, _round_up(E, 8))
    grid_e = pl.cdiv(E, tile_e)
    e_padded = grid_e * tile_e
    if e_padded != E:
        pad = e_padded - E
        si = jnp.pad(si, ((0, pad), (0, 0)))
        sj = jnp.pad(sj, ((0, pad), (0, 0)))
        e = jnp.pad(e, ((0, pad), (0, 0)))
        t = jnp.pad(t, (0, pad))

    ts2 = t.astype(jnp.float32).reshape(e_padded, 1)
    freq_row = basis_freq.astype(jnp.float32).reshape(1, d_t)
    phase_row = phase.astype(jnp.float32).reshape(1, d_t)
    w32 = w.astype(jnp.float32)
    b_row = b.astype(jnp.float32).reshape(1, H)

    kernel = functools.partial(_message_project_kernel, d_s=d_s, d_t=d_t, d_e=d_e)
    out = pl.pallas_call(
        kernel,
        out_shape=jax.ShapeDtypeStruct((e_padded, H), out_dtype),
        grid=(grid_e,),
        in_specs=[
            pl.BlockSpec((tile_e, 1), lambda i: (i, 0)),
            pl.BlockSpec((tile_e, d_s), lambda i: (i, 0)),
            pl.BlockSpec((tile_e, d_s), lambda i: (i, 0)),
            pl.BlockSpec((tile_e, d_e), lambda i: (i, 0)),
            pl.BlockSpec((1, d_t), lambda i: (0, 0)),
            pl.BlockSpec((1, d_t), lambda i: (0, 0)),
            pl.BlockSpec((d_out, H), lambda i: (0, 0)),         # W VMEM-resident
            pl.BlockSpec((1, H), lambda i: (0, 0)),
        ],
        out_specs=pl.BlockSpec((tile_e, H), lambda i: (i, 0)),
        compiler_params=pltpu.CompilerParams(
            dimension_semantics=("parallel",)),
    )(ts2, si, sj, e, freq_row, phase_row, w32, b_row)

    if e_padded != E:
        out = out[:E]
    return out


def make_time_encode_params(expand_dim):
    """Deterministic parameter init mirroring TimeEncode.__init__."""
    basis_freq = (1.0 / 10.0 ** np.linspace(0, 9, expand_dim)).astype(np.float32)
    phase = np.zeros(expand_dim, dtype=np.float32)
    return jnp.asarray(basis_freq), jnp.asarray(phase)


if __name__ == "__main__":
    key = jax.random.PRNGKey(0)
    k_ts, k_si, k_sj, k_e, k_t, k_w, k_b = jax.random.split(key, 7)

    # --- TimeEncode standalone: D=32 exercises the lane-packing + MXU path ---
    batch = 50           # not a multiple of pack -> exercises padding path too
    time_dim = 32
    basis_freq, phase = make_time_encode_params(time_dim)
    ts = jax.random.uniform(k_ts, (batch,), jnp.float32, 0.0, 100.0)
    ref_t = np.cos(np.asarray(ts, np.float64)[:, None]
                   * np.asarray(basis_freq, np.float64)[None, :]
                   + np.asarray(phase, np.float64)[None, :])

    out_t = jax.block_until_ready(time_encode(ts, basis_freq, phase))
    assert out_t.shape == (batch, time_dim)
    # tolerance budget: MXU multi-pass f32 rounding + f32 argument reduction
    # of |arg| up to ~100 against a float64 reference.
    np.testing.assert_allclose(np.asarray(out_t, np.float64), ref_t,
                               rtol=5e-4, atol=5e-4)

    # bf16 output halves HBM writeback (review item #1); looser tolerance.
    out_bf16 = jax.block_until_ready(
        time_encode(ts, basis_freq, phase, out_dtype=jnp.bfloat16))
    np.testing.assert_allclose(np.asarray(out_bf16, np.float64), ref_t,
                               rtol=2e-2, atol=2e-2)

    # --- Fused per-edge mail (id_msg_func), 128-lane-aligned feature widths ---
    n_edges = 64
    d_mem = 128          # in_feats_s (node memory width)
    d_time = 128         # in_feats_t
    d_edge = 128         # edge feature width
    bf2, ph2 = make_time_encode_params(d_time)
    si = jax.random.normal(k_si, (n_edges, d_mem), jnp.float32)
    sj = jax.random.normal(k_sj, (n_edges, d_mem), jnp.float32)
    ef = jax.random.normal(k_e, (n_edges, d_edge), jnp.float32)
    t = jax.random.uniform(k_t, (n_edges,), jnp.float32, 0.0, 100.0)

    mail = jax.block_until_ready(message_mail(si, sj, t, ef, bf2, ph2))
    time_ref = jnp.cos(t[:, None] * bf2[None, :] + ph2[None, :])
    mail_ref = jnp.concatenate([si, sj, time_ref, ef], axis=1)
    assert mail.shape == (n_edges, 2 * d_mem + d_time + d_edge)
    np.testing.assert_allclose(np.asarray(mail), np.asarray(mail_ref),
                               rtol=1e-5, atol=1e-5)

    # --- Fused mail + consumer projection (mail never materialized in HBM) ---
    d_mail = 2 * d_mem + d_time + d_edge
    hidden = 128
    w = jax.random.normal(k_w, (d_mail, hidden), jnp.float32) / np.sqrt(d_mail)
    b = jax.random.normal(k_b, (hidden,), jnp.float32)
    proj = jax.block_until_ready(
        message_mail_project(si, sj, t, ef, bf2, ph2, w, b))
    proj_ref = (np.asarray(mail_ref, np.float64) @ np.asarray(w, np.float64)
                + np.asarray(b, np.float64))
    assert proj.shape == (n_edges, hidden)
    np.testing.assert_allclose(np.asarray(proj, np.float64), proj_ref,
                               rtol=2e-2, atol=2e-2)

    print("KERNEL_OK")
</pallas_src>

<mosaic_0001>
module attributes {stable_mosaic.version = 11 : i64} {
  func.func @_time_encode_kernel(%arg0: i32, %arg1: memref<16x4xf32, #tpu.memory_space<vmem>>, %arg2: memref<4x128xf32, #tpu.memory_space<vmem>>, %arg3: memref<1x128xf32, #tpu.memory_space<vmem>>, %arg4: memref<16x128xf32, #tpu.memory_space<vmem>>) attributes {dimension_semantics = [#tpu.dimension_semantics<parallel>], iteration_bounds = array<i64: 1>, scalar_prefetch = 0 : i64, scratch_operands = 0 : i64, tpu.core_type = #tpu.core_type<tc>, window_params = [{transform_indices = @transform_0, window_bounds = array<i64: 16, 4>}, {pipeline_mode = #tpu.pipeline_mode<synchronous>, transform_indices = @transform_1, window_bounds = array<i64: 4, 128>}, {pipeline_mode = #tpu.pipeline_mode<synchronous>, transform_indices = @transform_2, window_bounds = array<i64: 1, 128>}, {transform_indices = @transform_3, window_bounds = array<i64: 16, 128>}]} {
    %c0 = arith.constant 0 : index
    %c0_0 = arith.constant 0 : index
    %0 = vector.load %arg1[%c0, %c0_0] : memref<16x4xf32, #tpu.memory_space<vmem>>, vector<16x4xf32>
    %c0_1 = arith.constant 0 : index
    %c0_2 = arith.constant 0 : index
    %1 = vector.load %arg2[%c0_1, %c0_2] : memref<4x128xf32, #tpu.memory_space<vmem>>, vector<4x128xf32>
    %cst = arith.constant dense<0.000000e+00> : vector<16x128xf32>
    %2 = tpu.matmul %0, %1, %cst {dimension_numbers = #tpu.dot_dimension_numbers<[1], [0], [0], [1], [0, 0, 1, 1], [], []>} : vector<16x4xf32>, vector<4x128xf32>, vector<16x128xf32> -> vector<16x128xf32>
    %c0_3 = arith.constant 0 : index
    %c0_4 = arith.constant 0 : index
    %3 = vector.load %arg3[%c0_3, %c0_4] : memref<1x128xf32, #tpu.memory_space<vmem>>, vector<1x128xf32>
    %4 = vector.broadcast %3 : vector<1x128xf32> to vector<16x128xf32>
    %5 = arith.addf %2, %4 : vector<16x128xf32>
    %6 = math.cos %5 : vector<16x128xf32>
    %c0_5 = arith.constant 0 : index
    %c0_6 = arith.constant 0 : index
    %7 = vector.load %arg4[%c0_5, %c0_6] : memref<16x128xf32, #tpu.memory_space<vmem>>, vector<16x128xf32>
    tpu.vector_store %arg4[%c0_5, %c0_6], %6 {strides = array<i32>} : memref<16x128xf32, #tpu.memory_space<vmem>>, vector<16x128xf32>,
    return
  }
  func.func @transform_0(%arg0: i32) -> (i32, i32) {
    %c0_i32 = arith.constant 0 : i32
    %c0_i32_0 = arith.constant 0 : i32
    return %arg0, %c0_i32 : i32, i32
  }
  func.func @transform_1(%arg0: i32) -> (i32, i32) {
    %c0_i32 = arith.constant 0 : i32
    %c0_i32_0 = arith.constant 0 : i32
    %c0_i32_1 = arith.constant 0 : i32
    return %c0_i32, %c0_i32_0 : i32, i32
  }
  func.func @transform_2(%arg0: i32) -> (i32, i32) {
    %c0_i32 = arith.constant 0 : i32
    %c0_i32_0 = arith.constant 0 : i32
    %c0_i32_1 = arith.constant 0 : i32
    return %c0_i32, %c0_i32_0 : i32, i32
  }
  func.func @transform_3(%arg0: i32) -> (i32, i32) {
    %c0_i32 = arith.constant 0 : i32
    %c0_i32_0 = arith.constant 0 : i32
    return %arg0, %c0_i32 : i32, i32
  }
}

</mosaic_0001>

<bundles_post_ra>
// kernel: tpu_custom_call.1
= control target key start
LH: loop header
LB: loop body
LE: loop exit
PB: predicated region body
PF: predicated region fallthrough
CT: control target
= control target key end

     0   :  { %vm32_vm0 = vcmask 1043456   ;;  %vm25_vm1 = vcmask 31744   ;;  %s535_s0 = inlined_call_operand.vmem [shape: f32[16,4], index: 0, kind: input, shape index: {}]   ;;  %s536_s1 = inlined_call_operand.vmem [shape: f32[4,128], index: 1, kind: input, shape index: {}]   ;;  %s537_s2 = inlined_call_operand.vmem [shape: f32[1,128], index: 2, kind: input, shape index: {}]   ;;  %s538_s3 = inlined_call_operand.hbm [shape: f32[16,128], index: 3, kind: output, shape index: {}]  }
   0x1   :  { %v17_v0 = vld [vmem:[%s536_s1] sm:$0xf]  ;;  %v16_v2 = vld [vmem:[%s535_s0 + $0x8] sm:$0xff] }
   0x2   :  { %v15_v1 = vld [vmem:[%s535_s0] sm:$0xff]  ;;  %350 = vmatprep.subr.msk.mxu0 %vm32_vm0, %v17_v0 }
   0x3   :  { %352 = vmatprep.mubr.msk.f32.mxu0 %vm25_vm1, %v15_v1 }
   0x4   :  { %8 = vsyncpa [#allocation3], 0  ;;  %351 = vmatpush3.msk.msra.mxu0 %vm32_vm0, %v17_v0  ;;  %v335_v3 = vld [vmem:[%s537_s2] ss:$0 sm:$0xff]  ;;  %v404_v28 = vmov 683565275  }
   0x5   :  { %353 = vmatmul.mubr.msk.f32.vlgmr.msra.gmra.mrb[0].mxu0 %vm25_vm1, %v16_v2  ;;  %v405_v32 = vmov 2475754826   ;;  %v406_v34 = vmov 2131351028   ;;  %v407_v36 = vmov 2102212464  }
   0x6   :  { %v408_v38 = vmov 920167782   ;;  %v409_v45 = vmov 1326507024   ;;  %s410_s0 = smov [#allocation2]  }
   0x7   :  { %s324_s1 = sshll.u32 %s410_s0, 4  ;;  %s325_s1 = int_to_ptr.vmem [resolvable:$true] %s324_s1 }
   0x8   :  { %s380_s2 = scalar_lea.vmem %s325_s1, 256  ;;  %p385_p1 = scmp.lt.s32.totalorder %s325_s1, %s325_s1 }
   0x9   :  { %p381_p0 = scmp.ne.s32.totalorder %s325_s1, %s380_s2  ;;  %p386_p2 = scmp.lt.s32.totalorder %s380_s2, %s380_s2 }
   0xb   :  { %p387_p3 = por %p386_p2, %p385_p1 }
   0xd   :  { %p388_p4 = pnand %p387_p3, %p381_p0 }
  0xd8   :  { %v354_v4 = vpop.f32.mrb[0].mxu0 }
  0xd9   :  { %v445_v5 = vadd.f32 %v354_v4, %v335_v3  ;;  %v102_v6 = vpop.f32.mrb[1].mxu0 }
  0xda   :  { %v447_v7 = vadd.f32 %v335_v3, %v102_v6 }
  0xdb   :  { %v214_v8 = vand.u32 2147483647, %v445_v5  ;;  %v217_v9 = vand.u32 2139095040, %v445_v5  ;;  %vm216_vm0 = vcmp.lt.s32.totalorder %v445_v5, 0 }
  0xdc   :  { %v114_v10 = vand.u32 2139095040, %v447_v7  ;;  %v111_v13 = vand.u32 2147483647, %v447_v7 }
  0xdd   :  { %v218_v11 = vshrl.u32 %v217_v9, 23  ;;  %v221_v12 = vand.u32 8388607, %v214_v8  ;;  %vm500_vm1 = vcmp.le.f32.partialorder %v214_v8, 0.7853982 }
  0xde   :  { %v115_v14 = vshrl.u32 %v114_v10, 23  ;;  %v457_v19 = vand.u32 8388607, %v111_v13 }
  0xdf   :  { %v343_v15 = vadd.s32 4294967169, %v218_v11  ;;  %v222_v18 = vor.u32 8388608, %v221_v12 }
  0xe0   :  { %v339_v16 = vadd.s32 4294967169, %v115_v14  ;;  %v119_v26 = vor.u32 8388608, %v457_v19 }
  0xe1   :  { %v224_v17 = vadd.s32 1, %v343_v15  ;;  %v459_v25 = vshll.u32 %v222_v18, 8 }
  0xe2   :  { %v121_v20 = vadd.s32 1, %v339_v16 }
  0xe3   :  { %vm225_vm2 = vcmp.gt.s32.totalorder %v224_v17, 0 }
  0xe4   :  { %v226_v21 = vsel %vm225_vm2, %v224_v17, 0  ;;  %vm122_vm3 = vcmp.gt.s32.totalorder %v121_v20, 0  ;;  %vm113_vm2 = vcmp.lt.s32.totalorder %v447_v7, 0 }
  0xe5   :  { %v227_v22 = vshrl.u32 %v226_v21, 5  ;;  %v228_v23 = vand.u32 31, %v226_v21  ;;  %v123_v24 = vsel %vm122_vm3, %v121_v20, 0  ;;  %v159_v20 = vshll.u32 %v119_v26, 8 }
  0xe6   :  { %v462_v30 = vshrl.u32 %v123_v24, 5  ;;  %v125_v31 = vand.u32 31, %v123_v24  ;;  %vm512_vm3 = vcmp.le.f32.partialorder %v111_v13, 0.7853982 }
  0xe7   :  { %v229_v27 = vsub.s32 32, %v228_v23  ;;  %v231_v29 = vshll.u32 %v404_v28, %v228_v23  ;;  %v234_v33 = vshll.u32 %v405_v32, %v228_v23  ;;  %v237_v35 = vshll.u32 %v406_v34, %v228_v23 }
  0xe8   :  { %v240_v37 = vshll.u32 %v407_v36, %v228_v23  ;;  %v243_v39 = vshll.u32 %v408_v38, %v228_v23  ;;  %vm246_vm4 = vcmp.lt.s32.totalorder %v227_v22, 1  ;;  %vm247_vm5 = vcmp.lt.s32.totalorder %v227_v22, 2 }
  0xe9   :  { %v232_v40 = vshrl.u32 %v405_v32, %v229_v27  ;;  %v235_v41 = vshrl.u32 %v406_v34, %v229_v27  ;;  %v238_v42 = vshrl.u32 %v407_v36, %v229_v27  ;;  %v230_v43 = vshrl.u32 %v404_v28, %v229_v27 }
  0xea   :  { %v241_v44 = vshrl.u32 %v408_v38, %v229_v27  ;;  %v244_v46 = vshrl.u32 %v409_v45, %v229_v27  ;;  %v126_v50 = vsub.s32 32, %v125_v31  ;;  %vm248_vm6 = vcmp.lt.s32.totalorder %v227_v22, 3 }
  0xeb   :  { %v233_v47 = vor.u32 %v232_v40, %v231_v29  ;;  %v236_v48 = vor.u32 %v235_v41, %v234_v33  ;;  %v239_v49 = vor.u32 %v238_v42, %v237_v35  ;;  %vm249_vm7 = vcmp.lt.s32.totalorder %v227_v22, 4 }
  0xec   :  { %v242_v51 = vor.u32 %v241_v44, %v240_v37  ;;  %v245_v52 = vor.u32 %v244_v46, %v243_v39  ;;  %v128_v60 = vshll.u32 %v404_v28, %v125_v31  ;;  %v129_v63 = vshrl.u32 %v405_v32, %v126_v50 }
  0xed   :  { %v250_v53 = vsel %vm246_vm4, %v230_v43, %v233_v47  ;;  %v251_v54 = vsel %vm249_vm7, %v239_v49, 2102212464  ;;  %v254_v55 = vsel %vm246_vm4, %v233_v47, %v236_v48  ;;  %v258_v56 = vsel %vm246_vm4, %v236_v48, %v239_v49 }
  0xee   :  { %v252_v57 = vsel %vm248_vm6, %v236_v48, %v251_v54  ;;  %v255_v58 = vsel %vm249_vm7, %v242_v51, 920167782  ;;  %v259_v59 = vsel %vm249_vm7, %v245_v52, 1326507024  ;;  %v131_v0 = vshll.u32 %v405_v32, %v125_v31 }
  0xef   :  { %v256_v61 = vsel %vm248_vm6, %v239_v49, %v255_v58  ;;  %v260_v62 = vsel %vm248_vm6, %v242_v51, %v259_v59  ;;  %v253_v1 = vsel %vm247_vm5, %v250_v53, %v252_v57  ;;  %v132_v4 = vshrl.u32 %v406_v34, %v126_v50 }
  0xf0   :  { %v257_v2 = vsel %vm247_vm5, %v254_v55, %v256_v61  ;;  %v261_v3 = vsel %vm247_vm5, %v258_v56, %v260_v62  ;;  %v130_v12 = vor.u32 %v129_v63, %v128_v60  ;;  %v134_v15 = vshll.u32 %v406_v34, %v125_v31 }
  0xf1   :  { %v471_v6 = vmul.u32.u64.low %v459_v25, %v261_v3  ;;  %v472_v9 = vmul.u32.u64.high %v459_v25, %v261_v3, %v471_v6  ;;  %v475_v10 = vmul.u32.u64.low %v459_v25, %v257_v2  ;;  %v476_v11 = vmul.u32.u64.high %v459_v25, %v257_v2, %v475_v10 }
  0xf2   :  { %v133_v14 = vor.u32 %v132_v4, %v131_v0  ;;  %v135_v16 = vshrl.u32 %v407_v36, %v126_v50  ;;  %v137_v17 = vshll.u32 %v407_v36, %v125_v31  ;;  %v138_v18 = vshrl.u32 %v408_v38, %v126_v50 }
  0xf3   :  { %v141_v19 = vshrl.u32 %v409_v45, %v126_v50  ;;  %v269_v21 = vmul.u32 %v459_v25, %v253_v1  ;;  %v127_v22 = vshrl.u32 %v404_v28, %v126_v50  ;;  %v140_v24 = vshll.u32 %v408_v38, %v125_v31 }
  0xf4   :  { %v136_v23 = vor.u32 %v135_v16, %v134_v15  ;;  %vm271_vm8 = vc.u32 %v472_v9, %v475_v10  ;;  %v272_v27 = vadd.s32 1, %v476_v11  ;;  %v139_v29 = vor.u32 %v138_v18, %v137_v17 }
  0xf5   :  { %vm143_vm9 = vcmp.lt.s32.totalorder %v462_v30, 1  ;;  %v142_v32 = vor.u32 %v141_v19, %v140_v24  ;;  %vm145_vm10 = vcmp.lt.s32.totalorder %v462_v30, 3  ;;  %vm146_vm11 = vcmp.lt.s32.totalorder %v462_v30, 4 }
  0xf6   :  { %v151_v33 = vsel %vm143_vm9, %v130_v12, %v133_v14  ;;  %v273_v26 = vsel %vm271_vm8, %v272_v27, %v476_v11  ;;  %v148_v34 = vsel %vm146_vm11, %v136_v23, 2102212464  ;;  %v152_v25 = vsel %vm146_vm11, %v139_v29, 920167782 }
  0xf7   :  { %v155_v28 = vsel %vm143_vm9, %v133_v14, %v136_v23  ;;  %v274_v35 = vadd.s32 %v273_v26, %v269_v21  ;;  %vm144_vm12 = vcmp.lt.s32.totalorder %v462_v30, 2  ;;  %v153_v31 = vsel %vm145_vm10, %v136_v23, %v152_v25 }
  0xf8   :  { %v156_v36 = vsel %vm146_vm11, %v142_v32, 1326507024  ;;  %v147_v37 = vsel %vm143_vm9, %v127_v22, %v130_v12  ;;  %v149_v38 = vsel %vm145_vm10, %v133_v14, %v148_v34  ;;  %v154_v39 = vsel %vm144_vm12, %v151_v33, %v153_v31 }
  0xf9   :  { %v157_v40 = vsel %vm145_vm10, %v139_v29, %v156_v36  ;;  %v275_v41 = vadd.s32 536870912, %v274_v35  ;;  %v486_v43 = vmul.u32.u64.low %v159_v20, %v154_v39  ;;  %v487_v44 = vmul.u32.u64.high %v159_v20, %v154_v39, %v486_v43 }
  0xfa   :  { %v158_v42 = vsel %vm144_vm12, %v155_v28, %v157_v40  ;;  %v150_v48 = vsel %vm144_vm12, %v147_v37, %v149_v38  ;;  %v270_v0 = vadd.s32 %v475_v10, %v472_v9  ;;  %vm306_vm7 = vweird.f32 %v445_v5 }
  0xfb   :  { %v489_v45 = vmul.u32.u64.low %v159_v20, %v158_v42  ;;  %v490_v46 = vmul.u32.u64.high %v159_v20, %v158_v42, %v489_v45  ;;  %v276_v47 = vshrl.u32 %v275_v41, 30  ;;  %v169_v50 = vadd.s32 1, %v487_v44 }
  0xfc   :  { %v166_v30 = vmul.u32 %v159_v20, %v150_v48  ;;  %vm203_vm11 = vweird.f32 %v447_v7 }
  0xfd   :  { %v277_v49 = vshll.u32 %v276_v47, 30  ;;  %vm168_vm13 = vc.u32 %v490_v46, %v486_v43  ;;  %v167_v21 = vadd.s32 %v486_v43, %v490_v46  ;;  %v300_v25 = vsub.s32 4, %v276_v47 }
  0xfe   :  { %v170_v52 = vsel %vm168_vm13, %v169_v50, %v487_v44 }
  0xff   :  { %v278_v51 = vsub.s32 %v274_v35, %v277_v49  ;;  %v171_v53 = vadd.s32 %v170_v52, %v166_v30  ;;  %v301_v37 = vsel %vm216_vm0, %v300_v25, %v276_v47 }
 0x100   :  { %v303_v39 = vsel %vm500_vm1, 0, %v301_v37 }
 0x101   :  { %v280_v54 = vsub.s32 0, %v278_v51  ;;  %v172_v55 = vadd.s32 536870912, %v171_v53  ;;  %v307_v43 = vand.u32 3, %v303_v39 }
 0x103   :  { %v344_v56 = vmin.u32 %v280_v54, %v278_v51  ;;  %v173_v57 = vshrl.u32 %v172_v55, 30  ;;  %vm312_vm4 = vcmp.eq.s32.totalorder %v307_v43, 2  ;;  %vm309_vm5 = vcmp.eq.s32.totalorder %v307_v43, 0 }
 0x104   :  { %vm308_vm6 = vcmp.lt.s32.totalorder %v307_v43, 2 }
 0x105   :  { %v282_v58 = vclz %v344_v56  ;;  %v174_v59 = vshll.u32 %v173_v57, 30  ;;  %v197_v42 = vsub.s32 4, %v173_v57 }
 0x107   :  { %v345_v60 = vadd.s32 4294967294, %v282_v58  ;;  %v175_v61 = vsub.s32 %v171_v53, %v174_v59  ;;  %v198_v47 = vsel %vm113_vm2, %v197_v42, %v173_v57 }
 0x108   :  { %v200_v50 = vsel %vm512_vm3, 0, %v198_v47 }
 0x109   :  { %vm346_vm14 = vcmp.lt.s32.totalorder %v345_v60, 0  ;;  %v177_v63 = vsub.s32 0, %v175_v61  ;;  %v204_v53 = vand.u32 3, %v200_v50 }
 0x10a   :  { %v285_v62 = vsel %vm346_vm14, 0, %v345_v60 }
 0x10b   :  { %v286_v1 = vsub.s32 32, %v285_v62  ;;  %v290_v2 = vsub.s32 4294967266, %v285_v62  ;;  %v340_v3 = vmin.u32 %v177_v63, %v175_v61  ;;  %v287_v4 = vshll.u32 %v278_v51, %v285_v62 }
 0x10c   :  { %vm209_vm8 = vcmp.eq.s32.totalorder %v204_v53, 2  ;;  %vm206_vm9 = vcmp.eq.s32.totalorder %v204_v53, 0  ;;  %vm205_vm10 = vcmp.lt.s32.totalorder %v204_v53, 2 }
 0x10d   :  { %v288_v6 = vshrl.u32 %v270_v0, %v286_v1  ;;  %v291_v11 = vadd.s32 127, %v290_v2  ;;  %v179_v12 = vclz %v340_v3 }
 0x10f   :  { %v289_v14 = vor.u32 %v288_v6, %v287_v4  ;;  %v292_v15 = vshll.u32 %v291_v11, 23  ;;  %v341_v16 = vadd.s32 4294967294, %v179_v12 }
 0x111   :  { %v293_v17 = vor.u32 4788187, %v292_v15  ;;  %vm342_vm15 = vcmp.lt.s32.totalorder %v341_v16, 0  ;;  %v296_v19 = vcvt.s32.f32 %v289_v14 }
 0x112   :  { %v182_v20 = vsel %vm342_vm15, 0, %v341_v16 }
 0x113   :  { %v294_v18 = vand.u32 2147483647, %v293_v17  ;;  %v183_v22 = vsub.s32 32, %v182_v20  ;;  %v187_v23 = vsub.s32 4294967266, %v182_v20  ;;  %v184_v10 = vshll.u32 %v175_v61, %v182_v20 }
 0x115   :  { %v297_v9 = vmul.f32 %v296_v19, %v294_v18  ;;  %v185_v24 = vshrl.u32 %v167_v21, %v183_v22  ;;  %v188_v27 = vadd.s32 127, %v187_v23 }
 0x117   :  { %v298_v29 = vxor.u32 2147483648, %v297_v9  ;;  %v186_v32 = vor.u32 %v185_v24, %v184_v10  ;;  %v189_v33 = vshll.u32 %v188_v27, 23 }
 0x119   :  { %v299_v34 = vsel %vm216_vm0, %v298_v29, %v297_v9  ;;  %v190_v35 = vor.u32 4788187, %v189_v33  ;;  %v193_v36 = vcvt.s32.f32 %v186_v32 }
 0x11a   :  { %v302_v28 = vsel %vm500_vm1, %v445_v5, %v299_v34 }
 0x11b   :  { %372 = vcosq.f32 %v302_v28  ;;  %v191_v31 = vand.u32 2147483647, %v190_v35 }
 0x11c   :  { %374 = vsinq.f32 %v302_v28 }
 0x11d   :  { %v194_v38 = vmul.f32 %v193_v36, %v191_v31 }
 0x11f   :  { %v195_v8 = vxor.u32 2147483648, %v194_v38 }
 0x121   :  { %v196_v41 = vsel %vm113_vm2, %v195_v8, %v194_v38 }
 0x122   :  { %v199_v44 = vsel %vm512_vm3, %v447_v7, %v196_v41 }
 0x123   :  { %376 = vcosq.f32 %v199_v44 }
 0x124   :  { %378 = vsinq.f32 %v199_v44 }
 0x125   :  { %v373_v45 = vpop.eup %372 }
 0x126   :  { %v375_v46 = vpop.eup %374  ;;  %v313_v48 = vxor.u32 2147483648, %v373_v45 }
 0x127   :  { %v310_v49 = vxor.u32 2147483648, %v375_v46 }
 0x128   :  { %v314_v13 = vsel %vm312_vm4, %v313_v48, %v375_v46 }
 0x129   :  { %v311_v30 = vsel %vm309_vm5, %v373_v45, %v310_v49 }
 0x12a   :  { %v315_v51 = vsel %vm308_vm6, %v311_v30, %v314_v13 }
 0x12b   :  { %v316_v52 = vsel %vm306_vm7, nan, %v315_v51 }
 0x12c   :  { %318 = vst [vmem:[#allocation2 + $0x8] sm:$0xff] %v316_v52 }
 0x12d   :  { %v377_v54 = vpop.eup %376 }
 0x12e   :  { %v379_v55 = vpop.eup %378  ;;  %v210_v56 = vxor.u32 2147483648, %v377_v54 }
 0x12f   :  { %v207_v57 = vxor.u32 2147483648, %v379_v55 }
 0x130   :  { %v211_v58 = vsel %vm209_vm8, %v210_v56, %v379_v55 }
 0x131   :  { %v208_v59 = vsel %vm206_vm9, %v377_v54, %v207_v57 }
 0x132   :  { %v212_v60 = vsel %vm205_vm10, %v208_v59, %v211_v58 }
 0x133   :  { %v213_v5 = vsel %vm203_vm11, nan, %v212_v60 }
 0x134   :  { %317 = vst [vmem:[#allocation2] sm:$0xff] %v213_v5 }
 0x135   :  { %391 = shalt.err (!%p388_p4)
}
 0x136   :  { %s392_s22 = scalar_lea.hbm %s538_s3, 256 }
 0x137   :  { %p393_p5 = scmp.ne.s32.totalorder %s538_s3, %s392_s22  ;;  %p396_p6 = scmp.lt.u32.totalorder %s392_s22, %s538_s3 }
 0x139   :  { %p398_p7 = pnand %p396_p6, %p393_p5 }
 0x13b   :  { %401 = shalt.err (!%p398_p7)
}
 0x13c   :  { %s411_s27 = smov 128   ;;  %s412_s28 = smov 8  }
 0x13d   :  { %330 = dma.vmem_to_hbm [thread:$0]  %s325_s1, 256, %s538_s3, [#allocation3], %s411_s27, %s411_s27, %s412_s28  }
 0x13e   :  { %402 = dma.done.wait [#allocation3], 256  }
 0x13f   :  { %403 = vsyncadd [#allocation3], 4294967040 }
 0x140   :  { %334 = vsyncpa [#allocation3], 1 }

</bundles_post_ra>
